<compile_context>
chip_gen: v6e
topology: v6e:2x2x1
jax: 0.10.0
libtpu: 0.0.40
codegen_flags: <defaults>
</compile_context>

<pallas_src>
import functools
import math

import jax
import jax.numpy as jnp
import numpy as np
from jax import lax
from jax.experimental import pallas as pl
from jax.experimental.pallas import tpu as pltpu


def _mha_kernel(q_ref, k_ref, v_ref,
                wq_ref, bq_ref, wk_ref, bk_ref, wv_ref, bv_ref,
                wo_ref, bo_ref,
                out_ref,
                *, num_heads, dim_q, dim_k):
    H, Dq, Dk = num_heads, dim_q, dim_k
    scale = 1.0 / math.sqrt(float(Dq))

    q = q_ref[0]                       # (Tq, D_in)  native dtype (no f32 upcast)
    k = k_ref[0]                       # (S,  D_in)
    v = v_ref[0]                       # (S,  D_in)
    Tq, S = q.shape[0], k.shape[0]

    # --- fused projections: one wide MXU matmul per Q/K/V (N = H*D) ------------
    qa = jnp.dot(q, wq_ref[...], preferred_element_type=jnp.float32) + bq_ref[...]
    ka = jnp.dot(k, wk_ref[...], preferred_element_type=jnp.float32) + bk_ref[...]
    va = jnp.dot(v, wv_ref[...], preferred_element_type=jnp.float32) + bv_ref[...]
    qa = qa * scale                    # scale Q, not the (Tq, S) score matrix

    qh = jnp.transpose(qa.reshape(Tq, H, Dq), (1, 0, 2))      # (H, Tq, Dq)
    kh = jnp.transpose(ka.reshape(S, H, Dq), (1, 0, 2))       # (H, S,  Dq)
    vh = jnp.transpose(va.reshape(S, H, Dk), (1, 0, 2))       # (H, S,  Dk)

    # --- scaled dot-product attention, batched over heads ----------------------
    # K^T is folded into the contraction (last axes of both operands).
    scores = lax.dot_general(qh, kh, (((2,), (2,)), ((0,), (0,))),
                             preferred_element_type=jnp.float32)   # (H, Tq, S)
    scores = scores - jnp.max(scores, axis=-1, keepdims=True)
    p = jnp.exp(scores)
    p = p * pl.reciprocal(jnp.sum(p, axis=-1, keepdims=True), approx=True)

    o = lax.dot_general(p, vh, (((2,), (1,)), ((0,), (0,))),
                        preferred_element_type=jnp.float32)        # (H, Tq, Dk)

    # --- output Linear: flatten heads into a lane-contiguous (Tq, H*Dk) slab ---
    concat = jnp.transpose(o, (1, 0, 2)).reshape(Tq, H * Dk)
    out = jnp.dot(concat.astype(wo_ref.dtype), wo_ref[...],
                  preferred_element_type=jnp.float32) + bo_ref[...]
    out_ref[0] = out.astype(out_ref.dtype)


def _pick_q_tile(S):
    """Largest convenient q-tile: multiple of 8 that divides S (<=512)."""
    for cand in (512, 256, 128, 64, 32, 16, 8):
        if cand <= S and S % cand == 0:
            return cand
    return S


def _estimate_vmem_bytes(S, tq, D_in, H, Dq, Dk, in_dtype):
    e = jnp.dtype(in_dtype).itemsize
    f32 = 4
    # double-buffered pipelined I/O tiles (q tile, full K, full V, out tile)
    io = 2 * e * (tq * D_in + 2 * S * D_in + tq * D_in)
    # replicated weights (the pipeline still double-buffers them)
    w = 2 * e * (2 * D_in * H * Dq + D_in * H * Dk + H * Dk * D_in
                 + 2 * H * Dq + H * Dk + D_in)
    # in-kernel f32 intermediates (projections, head views, scores, probs, outs)
    tmp = f32 * (2 * tq * H * Dq + 2 * S * (H * Dq + H * Dk)
                 + 2 * H * tq * S + 2 * tq * H * Dk + tq * D_in)
    return io + w + tmp


def multi_headed_attention(query, key, value, params, *, q_tile=None):
    """query/key/value: [B, S, D_in]; params: dict of stacked per-head weights."""
    B, S, D_in = query.shape
    wq, bq = params["wq"], params["bq"]   # (H, D_in, Dq), (H, Dq)
    wk, bk = params["wk"], params["bk"]   # (H, D_in, Dq), (H, Dq)
    wv, bv = params["wv"], params["bv"]   # (H, D_in, Dk), (H, Dk)
    wo, bo = params["wo"], params["bo"]   # (H*Dk, D_in), (1, D_in)
    H, _, Dq = wq.shape
    Dk = wv.shape[2]

    # Stack per-head projection weights into wide (D_in, H*D) matrices so the
    # projections run as single MXU-filling matmuls inside the kernel.
    wq_all = jnp.transpose(wq, (1, 0, 2)).reshape(D_in, H * Dq)
    wk_all = jnp.transpose(wk, (1, 0, 2)).reshape(D_in, H * Dq)
    wv_all = jnp.transpose(wv, (1, 0, 2)).reshape(D_in, H * Dk)
    bq_all = bq.reshape(1, H * Dq)
    bk_all = bk.reshape(1, H * Dq)
    bv_all = bv.reshape(1, H * Dk)

    tq = q_tile if q_tile is not None else _pick_q_tile(S)
    grid = (B, S // tq)

    vmem_limit = int(min(max(2 * _estimate_vmem_bytes(S, tq, D_in, H, Dq, Dk,
                                                      query.dtype),
                             32 * 1024 * 1024),
                         64 * 1024 * 1024))

    kernel = functools.partial(_mha_kernel, num_heads=H, dim_q=Dq, dim_k=Dk)
    full = lambda shape: pl.BlockSpec(shape, lambda b, i: (0,) * len(shape))

    # NOTE: for production shapes keep D_in and H*Dk multiples of 128 so the
    # output stores are lane-dense (unmasked vst); toy dims stay unpadded here.
    return pl.pallas_call(
        kernel,
        out_shape=jax.ShapeDtypeStruct((B, S, D_in), query.dtype),
        grid_spec=pltpu.PrefetchScalarGridSpec(
            num_scalar_prefetch=0,
            grid=grid,
            in_specs=[
                pl.BlockSpec((1, tq, D_in), lambda b, i: (b, i, 0)),   # query tile
                pl.BlockSpec((1, S, D_in), lambda b, i: (b, 0, 0)),    # full key
                pl.BlockSpec((1, S, D_in), lambda b, i: (b, 0, 0)),    # full value
                full((D_in, H * Dq)), full((1, H * Dq)),               # Wq, bq
                full((D_in, H * Dq)), full((1, H * Dq)),               # Wk, bk
                full((D_in, H * Dk)), full((1, H * Dk)),               # Wv, bv
                full((H * Dk, D_in)), full((1, D_in)),                 # Wo, bo
            ],
            out_specs=pl.BlockSpec((1, tq, D_in), lambda b, i: (b, i, 0)),
        ),
        compiler_params=pltpu.CompilerParams(
            dimension_semantics=("parallel", "parallel"),
            vmem_limit_bytes=vmem_limit,
        ),
    )(query, key, value,
      wq_all, bq_all, wk_all, bk_all, wv_all, bv_all, wo, bo)


def init_params(key, num_heads, dim_in, dim_q, dim_k):
    """Deterministic init mimicking nn.Linear (uniform +/- 1/sqrt(fan_in))."""
    ks = jax.random.split(key, 8)
    def u(k, shape, fan_in):
        lim = 1.0 / math.sqrt(fan_in)
        return jax.random.uniform(k, shape, jnp.float32, -lim, lim)
    return {
        "wq": u(ks[0], (num_heads, dim_in, dim_q), dim_in),
        "bq": u(ks[1], (num_heads, dim_q), dim_in),
        "wk": u(ks[2], (num_heads, dim_in, dim_q), dim_in),
        "bk": u(ks[3], (num_heads, dim_q), dim_in),
        "wv": u(ks[4], (num_heads, dim_in, dim_k), dim_in),
        "bv": u(ks[5], (num_heads, dim_k), dim_in),
        "wo": u(ks[6], (num_heads * dim_k, dim_in), num_heads * dim_k),
        "bo": u(ks[7], (1, dim_in), num_heads * dim_k),
    }


def reference_mha(query, key, value, params):
    """Pure-JAX reference matching the PyTorch module."""
    H = params["wq"].shape[0]
    Dq = params["wq"].shape[2]
    outs = []
    for h in range(H):
        Q = query @ params["wq"][h] + params["bq"][h]
        K = key @ params["wk"][h] + params["bk"][h]
        V = value @ params["wv"][h] + params["bv"][h]
        scores = (Q @ jnp.swapaxes(K, -1, -2)) / math.sqrt(Dq)
        p = jax.nn.softmax(scores, axis=-1)
        outs.append(p @ V)
    cat = jnp.concatenate(outs, axis=-1)
    return cat @ params["wo"] + params["bo"][0]


if __name__ == "__main__":
    num_heads, dim_in, dim_q, dim_k = 4, 32, 16, 16
    B, S = 2, 8

    key = jax.random.PRNGKey(0)
    kq, kk, kv, kp = jax.random.split(key, 4)
    query = jax.random.normal(kq, (B, S, dim_in), jnp.float32)
    keyx = jax.random.normal(kk, (B, S, dim_in), jnp.float32)
    value = jax.random.normal(kv, (B, S, dim_in), jnp.float32)
    params = init_params(kp, num_heads, dim_in, dim_q, dim_k)

    out = multi_headed_attention(query, keyx, value, params)
    out = jax.block_until_ready(out)

    ref = reference_mha(query, keyx, value, params)
    # Tolerance loosened slightly for the EUP approximate reciprocal in softmax.
    np.testing.assert_allclose(np.asarray(out), np.asarray(ref), rtol=2e-3, atol=2e-3)

    print("KERNEL_OK")
</pallas_src>

<mosaic_0001>
module attributes {stable_mosaic.version = 11 : i64} {
  func.func @_mha_kernel(%arg0: i32, %arg1: i32, %arg2: memref<1x8x32xf32, #tpu.memory_space<vmem>>, %arg3: memref<1x8x32xf32, #tpu.memory_space<vmem>>, %arg4: memref<1x8x32xf32, #tpu.memory_space<vmem>>, %arg5: memref<32x64xf32, #tpu.memory_space<vmem>>, %arg6: memref<1x64xf32, #tpu.memory_space<vmem>>, %arg7: memref<32x64xf32, #tpu.memory_space<vmem>>, %arg8: memref<1x64xf32, #tpu.memory_space<vmem>>, %arg9: memref<32x64xf32, #tpu.memory_space<vmem>>, %arg10: memref<1x64xf32, #tpu.memory_space<vmem>>, %arg11: memref<64x32xf32, #tpu.memory_space<vmem>>, %arg12: memref<1x32xf32, #tpu.memory_space<vmem>>, %arg13: memref<1x8x32xf32, #tpu.memory_space<vmem>>) attributes {dimension_semantics = [#tpu.dimension_semantics<parallel>, #tpu.dimension_semantics<parallel>], iteration_bounds = array<i64: 2, 1>, scalar_prefetch = 0 : i64, scratch_operands = 0 : i64, tpu.core_type = #tpu.core_type<tc>, window_params = [{transform_indices = @transform_0, window_bounds = array<i64: 1, 8, 32>}, {transform_indices = @transform_1, window_bounds = array<i64: 1, 8, 32>}, {transform_indices = @transform_2, window_bounds = array<i64: 1, 8, 32>}, {pipeline_mode = #tpu.pipeline_mode<synchronous>, transform_indices = @transform_3, window_bounds = array<i64: 32, 64>}, {pipeline_mode = #tpu.pipeline_mode<synchronous>, transform_indices = @transform_4, window_bounds = array<i64: 1, 64>}, {pipeline_mode = #tpu.pipeline_mode<synchronous>, transform_indices = @transform_5, window_bounds = array<i64: 32, 64>}, {pipeline_mode = #tpu.pipeline_mode<synchronous>, transform_indices = @transform_6, window_bounds = array<i64: 1, 64>}, {pipeline_mode = #tpu.pipeline_mode<synchronous>, transform_indices = @transform_7, window_bounds = array<i64: 32, 64>}, {pipeline_mode = #tpu.pipeline_mode<synchronous>, transform_indices = @transform_8, window_bounds = array<i64: 1, 64>}, {pipeline_mode = #tpu.pipeline_mode<synchronous>, transform_indices = @transform_9, window_bounds = array<i64: 64, 32>}, {pipeline_mode = #tpu.pipeline_mode<synchronous>, transform_indices = @transform_10, window_bounds = array<i64: 1, 32>}, {transform_indices = @transform_11, window_bounds = array<i64: 1, 8, 32>}]} {
    %c0 = arith.constant 0 : index
    %c0_0 = arith.constant 0 : index
    %c0_1 = arith.constant 0 : index
    %0 = vector.load %arg2[%c0, %c0_0, %c0_1] : memref<1x8x32xf32, #tpu.memory_space<vmem>>, vector<1x8x32xf32>
    %1 = vector.shape_cast %0 : vector<1x8x32xf32> to vector<8x32xf32>
    %c0_2 = arith.constant 0 : index
    %c0_3 = arith.constant 0 : index
    %c0_4 = arith.constant 0 : index
    %2 = vector.load %arg3[%c0_2, %c0_3, %c0_4] : memref<1x8x32xf32, #tpu.memory_space<vmem>>, vector<1x8x32xf32>
    %3 = vector.shape_cast %2 : vector<1x8x32xf32> to vector<8x32xf32>
    %c0_5 = arith.constant 0 : index
    %c0_6 = arith.constant 0 : index
    %c0_7 = arith.constant 0 : index
    %4 = vector.load %arg4[%c0_5, %c0_6, %c0_7] : memref<1x8x32xf32, #tpu.memory_space<vmem>>, vector<1x8x32xf32>
    %5 = vector.shape_cast %4 : vector<1x8x32xf32> to vector<8x32xf32>
    %c0_8 = arith.constant 0 : index
    %c0_9 = arith.constant 0 : index
    %6 = vector.load %arg5[%c0_8, %c0_9] : memref<32x64xf32, #tpu.memory_space<vmem>>, vector<32x64xf32>
    %cst = arith.constant dense<0.000000e+00> : vector<8x64xf32>
    %7 = tpu.matmul %1, %6, %cst {dimension_numbers = #tpu.dot_dimension_numbers<[1], [0], [0], [1], [0, 0, 1, 1], [], []>} : vector<8x32xf32>, vector<32x64xf32>, vector<8x64xf32> -> vector<8x64xf32>
    %c0_10 = arith.constant 0 : index
    %c0_11 = arith.constant 0 : index
    %8 = vector.load %arg6[%c0_10, %c0_11] : memref<1x64xf32, #tpu.memory_space<vmem>>, vector<1x64xf32>
    %9 = vector.broadcast %8 : vector<1x64xf32> to vector<8x64xf32>
    %10 = arith.addf %7, %9 : vector<8x64xf32>
    %c0_12 = arith.constant 0 : index
    %c0_13 = arith.constant 0 : index
    %11 = vector.load %arg7[%c0_12, %c0_13] : memref<32x64xf32, #tpu.memory_space<vmem>>, vector<32x64xf32>
    %cst_14 = arith.constant dense<0.000000e+00> : vector<8x64xf32>
    %12 = tpu.matmul %3, %11, %cst_14 {dimension_numbers = #tpu.dot_dimension_numbers<[1], [0], [0], [1], [0, 0, 1, 1], [], []>} : vector<8x32xf32>, vector<32x64xf32>, vector<8x64xf32> -> vector<8x64xf32>
    %c0_15 = arith.constant 0 : index
    %c0_16 = arith.constant 0 : index
    %13 = vector.load %arg8[%c0_15, %c0_16] : memref<1x64xf32, #tpu.memory_space<vmem>>, vector<1x64xf32>
    %14 = vector.broadcast %13 : vector<1x64xf32> to vector<8x64xf32>
    %15 = arith.addf %12, %14 : vector<8x64xf32>
    %c0_17 = arith.constant 0 : index
    %c0_18 = arith.constant 0 : index
    %16 = vector.load %arg9[%c0_17, %c0_18] : memref<32x64xf32, #tpu.memory_space<vmem>>, vector<32x64xf32>
    %cst_19 = arith.constant dense<0.000000e+00> : vector<8x64xf32>
    %17 = tpu.matmul %5, %16, %cst_19 {dimension_numbers = #tpu.dot_dimension_numbers<[1], [0], [0], [1], [0, 0, 1, 1], [], []>} : vector<8x32xf32>, vector<32x64xf32>, vector<8x64xf32> -> vector<8x64xf32>
    %c0_20 = arith.constant 0 : index
    %c0_21 = arith.constant 0 : index
    %18 = vector.load %arg10[%c0_20, %c0_21] : memref<1x64xf32, #tpu.memory_space<vmem>>, vector<1x64xf32>
    %19 = vector.broadcast %18 : vector<1x64xf32> to vector<8x64xf32>
    %20 = arith.addf %17, %19 : vector<8x64xf32>
    %cst_22 = arith.constant 2.500000e-01 : f32
    %21 = vector.broadcast %cst_22 : f32 to vector<8x64xf32>
    %22 = arith.mulf %10, %21 : vector<8x64xf32>
    %23 = vector.shape_cast %22 : vector<8x64xf32> to vector<8x4x16xf32>
    %24 = tpu.transpose %23, [1, 0, 2] : vector<8x4x16xf32> -> vector<4x8x16xf32>
    %25 = vector.shape_cast %15 : vector<8x64xf32> to vector<8x4x16xf32>
    %26 = tpu.transpose %25, [1, 0, 2] : vector<8x4x16xf32> -> vector<4x8x16xf32>
    %27 = vector.shape_cast %20 : vector<8x64xf32> to vector<8x4x16xf32>
    %28 = tpu.transpose %27, [1, 0, 2] : vector<8x4x16xf32> -> vector<4x8x16xf32>
    %cst_23 = arith.constant dense<0.000000e+00> : vector<4x8x8xf32>
    %29 = tpu.matmul %24, %26, %cst_23 {dimension_numbers = #tpu.dot_dimension_numbers<[2], [2], [1], [1], [0, 0, 0, 1, 1, 1], [0], [0]>} : vector<4x8x16xf32>, vector<4x8x16xf32>, vector<4x8x8xf32> -> vector<4x8x8xf32>
    %cst_24 = arith.constant dense<0xFF800000> : vector<4x8xf32>
    %30 = vector.multi_reduction <maximumf>, %29, %cst_24 [2] : vector<4x8x8xf32> to vector<4x8xf32>
    %31 = vector.shape_cast %30 : vector<4x8xf32> to vector<4x8x1xf32>
    %32 = vector.broadcast %31 : vector<4x8x1xf32> to vector<4x8x8xf32>
    %33 = arith.subf %29, %32 : vector<4x8x8xf32>
    %34 = math.exp %33 : vector<4x8x8xf32>
    %cst_25 = arith.constant dense<0.000000e+00> : vector<4x8xf32>
    %35 = vector.multi_reduction <add>, %34, %cst_25 [2] : vector<4x8x8xf32> to vector<4x8xf32>
    %36 = vector.shape_cast %35 : vector<4x8xf32> to vector<4x8x1xf32>
    %37 = tpu.reciprocal %36 {approx = true} : vector<4x8x1xf32> -> vector<4x8x1xf32>
    %38 = vector.broadcast %37 : vector<4x8x1xf32> to vector<4x8x8xf32>
    %39 = arith.mulf %34, %38 : vector<4x8x8xf32>
    %cst_26 = arith.constant dense<0.000000e+00> : vector<4x8x16xf32>
    %40 = tpu.matmul %39, %28, %cst_26 {dimension_numbers = #tpu.dot_dimension_numbers<[2], [1], [1], [2], [0, 0, 0, 1, 1, 2], [0], [0]>} : vector<4x8x8xf32>, vector<4x8x16xf32>, vector<4x8x16xf32> -> vector<4x8x16xf32>
    %41 = tpu.transpose %40, [1, 0, 2] : vector<4x8x16xf32> -> vector<8x4x16xf32>
    %42 = vector.shape_cast %41 : vector<8x4x16xf32> to vector<8x64xf32>
    %c0_27 = arith.constant 0 : index
    %c0_28 = arith.constant 0 : index
    %43 = vector.load %arg11[%c0_27, %c0_28] : memref<64x32xf32, #tpu.memory_space<vmem>>, vector<64x32xf32>
    %cst_29 = arith.constant dense<0.000000e+00> : vector<8x32xf32>
    %44 = tpu.matmul %42, %43, %cst_29 {dimension_numbers = #tpu.dot_dimension_numbers<[1], [0], [0], [1], [0, 0, 1, 1], [], []>} : vector<8x64xf32>, vector<64x32xf32>, vector<8x32xf32> -> vector<8x32xf32>
    %c0_30 = arith.constant 0 : index
    %c0_31 = arith.constant 0 : index
    %45 = vector.load %arg12[%c0_30, %c0_31] : memref<1x32xf32, #tpu.memory_space<vmem>>, vector<1x32xf32>
    %46 = vector.broadcast %45 : vector<1x32xf32> to vector<8x32xf32>
    %47 = arith.addf %44, %46 : vector<8x32xf32>
    %c0_32 = arith.constant 0 : index
    %c0_33 = arith.constant 0 : index
    %c0_34 = arith.constant 0 : index
    %48 = vector.load %arg13[%c0_32, %c0_33, %c0_34] : memref<1x8x32xf32, #tpu.memory_space<vmem>>, vector<1x8x32xf32>
    %49 = vector.shape_cast %48 : vector<1x8x32xf32> to vector<8x32xf32>
    %50 = vector.shape_cast %47 : vector<8x32xf32> to vector<1x8x32xf32>
    tpu.vector_store %arg13[%c0_32, %c0_33, %c0_34], %50 {strides = array<i32>} : memref<1x8x32xf32, #tpu.memory_space<vmem>>, vector<1x8x32xf32>,
    return
  }
  func.func @transform_0(%arg0: i32, %arg1: i32) -> (i32, i32, i32) {
    %c0_i32 = arith.constant 0 : i32
    %c0_i32_0 = arith.constant 0 : i32
    return %arg0, %arg1, %c0_i32 : i32, i32, i32
  }
  func.func @transform_1(%arg0: i32, %arg1: i32) -> (i32, i32, i32) {
    %c0_i32 = arith.constant 0 : i32
    %c0_i32_0 = arith.constant 0 : i32
    %c0_i32_1 = arith.constant 0 : i32
    return %arg0, %c0_i32, %c0_i32_0 : i32, i32, i32
  }
  func.func @transform_2(%arg0: i32, %arg1: i32) -> (i32, i32, i32) {
    %c0_i32 = arith.constant 0 : i32
    %c0_i32_0 = arith.constant 0 : i32
    %c0_i32_1 = arith.constant 0 : i32
    return %arg0, %c0_i32, %c0_i32_0 : i32, i32, i32
  }
  func.func @transform_3(%arg0: i32, %arg1: i32) -> (i32, i32) {
    %c0_i32 = arith.constant 0 : i32
    %c0_i32_0 = arith.constant 0 : i32
    %c0_i32_1 = arith.constant 0 : i32
    return %c0_i32, %c0_i32_0 : i32, i32
  }
  func.func @transform_4(%arg0: i32, %arg1: i32) -> (i32, i32) {
    %c0_i32 = arith.constant 0 : i32
    %c0_i32_0 = arith.constant 0 : i32
    %c0_i32_1 = arith.constant 0 : i32
    return %c0_i32, %c0_i32_0 : i32, i32
  }
  func.func @transform_5(%arg0: i32, %arg1: i32) -> (i32, i32) {
    %c0_i32 = arith.constant 0 : i32
    %c0_i32_0 = arith.constant 0 : i32
    %c0_i32_1 = arith.constant 0 : i32
    return %c0_i32, %c0_i32_0 : i32, i32
  }
  func.func @transform_6(%arg0: i32, %arg1: i32) -> (i32, i32) {
    %c0_i32 = arith.constant 0 : i32
    %c0_i32_0 = arith.constant 0 : i32
    %c0_i32_1 = arith.constant 0 : i32
    return %c0_i32, %c0_i32_0 : i32, i32
  }
  func.func @transform_7(%arg0: i32, %arg1: i32) -> (i32, i32) {
    %c0_i32 = arith.constant 0 : i32
    %c0_i32_0 = arith.constant 0 : i32
    %c0_i32_1 = arith.constant 0 : i32
    return %c0_i32, %c0_i32_0 : i32, i32
  }
  func.func @transform_8(%arg0: i32, %arg1: i32) -> (i32, i32) {
    %c0_i32 = arith.constant 0 : i32
    %c0_i32_0 = arith.constant 0 : i32
    %c0_i32_1 = arith.constant 0 : i32
    return %c0_i32, %c0_i32_0 : i32, i32
  }
  func.func @transform_9(%arg0: i32, %arg1: i32) -> (i32, i32) {
    %c0_i32 = arith.constant 0 : i32
    %c0_i32_0 = arith.constant 0 : i32
    %c0_i32_1 = arith.constant 0 : i32
    return %c0_i32, %c0_i32_0 : i32, i32
  }
  func.func @transform_10(%arg0: i32, %arg1: i32) -> (i32, i32) {
    %c0_i32 = arith.constant 0 : i32
    %c0_i32_0 = arith.constant 0 : i32
    %c0_i32_1 = arith.constant 0 : i32
    return %c0_i32, %c0_i32_0 : i32, i32
  }
  func.func @transform_11(%arg0: i32, %arg1: i32) -> (i32, i32, i32) {
    %c0_i32 = arith.constant 0 : i32
    %c0_i32_0 = arith.constant 0 : i32
    return %arg0, %arg1, %c0_i32 : i32, i32, i32
  }
}

</mosaic_0001>

<bundles_post_ra>
// kernel: tpu_custom_call.1
= control target key start
LH: loop header
LB: loop body
LE: loop exit
PB: predicated region body
PF: predicated region fallthrough
CT: control target
= control target key end

     0   :  { %s3176_s0 = inlined_call_operand.hbm [shape: f32[2,8,32], index: 0, kind: input, shape index: {}]   ;;  %s3177_s1 = inlined_call_operand.hbm [shape: f32[2,8,32], index: 1, kind: input, shape index: {}]   ;;  %s3178_s2 = inlined_call_operand.hbm [shape: f32[2,8,32], index: 2, kind: input, shape index: {}]   ;;  %s3179_s3 = inlined_call_operand.vmem [shape: f32[32,64], index: 3, kind: input, shape index: {}]   ;;  %s3180_s4 = inlined_call_operand.vmem [shape: f32[1,64], index: 4, kind: input, shape index: {}]   ;;  %s3181_s5 = inlined_call_operand.vmem [shape: f32[32,64], index: 5, kind: input, shape index: {}]   ;;  %s3182_s6 = inlined_call_operand.vmem [shape: f32[1,64], index: 6, kind: input, shape index: {}]   ;;  %s3183_s7 = inlined_call_operand.vmem [shape: f32[32,64], index: 7, kind: input, shape index: {}]   ;;  %s3184_s8 = inlined_call_operand.vmem [shape: f32[1,64], index: 8, kind: input, shape index: {}]   ;;  %s3185_s9 = inlined_call_operand.vmem [shape: f32[64,32], index: 9, kind: input, shape index: {}]   ;;  %s3186_s10 = inlined_call_operand.vmem [shape: f32[1,32], index: 10, kind: input, shape index: {}]   ;;  %s3187_s11 = inlined_call_operand.hbm [shape: f32[2,8,32], index: 11, kind: output, shape index: {}]  }
   0x1   :  { %3198 = sst [smem:[#allocation20_spill]] %s3177_s1 }
   0x2   :  { %3199 = sst [smem:[#allocation21_spill]] %s3186_s10 }
   0x3   :  { %3200 = sst [smem:[#allocation22_spill]] %s3187_s11 }
   0x4   :  { %16 = vsyncpa [#allocation3], 0 }
   0x5   :  { %18 = vsyncpa [#allocation3 + $0x1], 0 }
   0x6   :  { %19 = vsyncpa [#allocation6], 0 }
   0x7   :  { %21 = vsyncpa [#allocation6 + $0x1], 0 }
   0x8   :  { %22 = vsyncpa [#allocation4], 0 }
   0x9   :  { %24 = vsyncpa [#allocation4 + $0x1], 0  ;;  %s2728_s17 = smov 0   ;;  %s2730_s18 = smov 0  }
   0xa   :  { %s2732_s19 = smov 0   ;;  %s2734_s20 = smov 0  }
   0xb   :  { %s2736_s21 = smov 0   ;;  %s2738_s22 = smov 0  }
   0xc LB: > { %3201 = sst [smem:[#allocation12_spill]] %s2632_s17  ;;  %s2759_s23 = sadd.s32 4294967295, %s2652_s22   ;;  %s2652_s22 = sphi %s2738_s22, %s30_s22   ;;  %s2648_s21 = sphi %s2736_s21, %s3228_s21   ;;  %s2644_s20 = sphi %s2734_s20, %s3227_s20   ;;  %s2640_s19 = sphi %s2732_s19, %s3231_s19   ;;  %s2636_s18 = sphi %s2730_s18, %s3230_s18   ;;  %s2632_s17 = sphi %s2728_s17, %s3229_s17  }
   0xd   : > { %3202 = sst [smem:[#allocation13_spill]] %s2644_s20  ;;  %s2208_s24 = sadd.s32 4294967294, %s2652_s22  }
   0xe   : > { %3203 = sst [smem:[#allocation14_spill]] %s2648_s21  ;;  %s42_s25 = sadd.s32 1, %s2648_s21 }
   0xf   : > { %3204 = sst [smem:[#allocation15_spill]] %s2652_s22  ;;  %s51_s26 = sadd.s32 1, %s2640_s19 }
  0x10   : > { %p44_p0 = scmp.ge.s32.totalorder %s42_s25, 2  ;;  %p58_p1 = scmp.ne.s32.totalorder %s2640_s19, %s2636_s18 }
  0x11   : > { %p59_p2 = scmp.eq.s32.totalorder %s2652_s22, 0  ;;  %p64_p3 = scmp.ne.s32.totalorder %s2636_s18, %s2632_s17 }
  0x12   : > { %s3233_s25 = smov (%p44_p0, %s42_s25), 0  ;;  %p65_p5 = scmp.eq.s32.totalorder %s2759_s23, 0 }
  0x13   : > { %3205 = sst [smem:[#allocation16_spill]] %s3233_s25  ;;  %p2771_p4 = por %p59_p2, %p58_p1 }
  0x14   : > { %s46_s28 = ssub.s32 %s2648_s21, %s3233_s25  ;;  %p310_p6 = scmp.eq.s32.totalorder %s2759_s23, 1 }
  0x15   : > { %p49_p7 = scmp.eq.s32.totalorder %s46_s28, 0  ;;  %p2779_p8 = por %p65_p5, %p64_p3 }
  0x16   : > { %p2783_p9 = por %p310_p6, %p58_p1  ;;  %p316_p10 = scmp.eq.s32.totalorder %s2208_s24, 1 }
  0x17   : > { %s2788_s12 = scalar_select %p49_p7, %s2640_s19, %s51_s26  }
  0x18   : > { %s3208_s30 = scalar_select %p2783_p9, 1, 0 }
  0x19   : > { %3210 = sst [smem:[#allocation18_spill]] %s2788_s12  ;;  %p2790_p11 = por %p316_p10, %p64_p3 }
  0x1a   : > { %3209 = sst [smem:[#allocation17_spill]] %s3208_s30  ;;  %p2408_p13 = scmp.lt.s32.totalorder %s2652_s22, 2 }
  0x1b   : > { %s3211_s13 = scalar_select %p2790_p11, 1, 0 }
  0x1c   : > { %s3191_s14 = sand.u32 1, %s2640_s19   ;;  %s2802_s16 = sshll.u32 %s2648_s21, 7 }
  0x1d   : > { %3212 = sst [smem:[#allocation19_spill]] %s3211_s13  ;;  %s2799_s15 = sshll.u32 %s3191_s14, 3 }
  0x1e   : > { %p2806_p0 = pnand %p2408_p13, %p2771_p4  ;;  %s379_s24 = sand.u32 1, %s2652_s22  }
  0x1f   : > { %s3214_s1 = sld [smem:[#allocation20_spill]]  ;;  %s383_s13 = scalar_lea.vmem [#allocation5], %s2799_s15 }
  0x20   : > { %s390_s17 = sshll.u32 %s383_s13, 4  ;;  %p2217_p1 = scmp.ge.s32.totalorder %s2652_s22, 1  ;;  %s391_s17 = int_to_ptr.vmem [resolvable:$true] %s390_s17 }
  0x21   : > { %p413_p2 = scmp.lt.s32.totalorder %s2652_s22, 3  ;;  %s2818_s14 = scalar_lea.sflag [#allocation6], %s379_s24 }
  0x22   : > { %p2486_p3 = pneg %p2806_p0  ;;  %s2497_s27 = scalar_lea.vmem %s391_s17, 128 }
  0x23   : > { %p2498_p4 = scmp.ne.s32.totalorder %s391_s17, %s2497_s27  ;;  %s2654_s21 = smov [#allocation5]  }
  0x24   : > { %s2502_s11 = sshll.u32 %s2654_s21, 4  ;;  %s2503_s11 = int_to_ptr.vmem [resolvable:$false] %s2502_s11 }
  0x25   : > { %s388_s12 = scalar_lea.hbm %s3214_s1, %s2802_s16  ;;  %p2500_p5 = pnand %p2498_p4, %p2486_p3 }
  0x26   : > { %s2504_s25 = scalar_lea.vmem %s2503_s11, 256  ;;  %p2505_p7 = scmp.lt.s32.totalorder %s391_s17, %s2503_s11 }
  0x27   : > { %p2501_p6 = pneg %p2500_p5  ;;  %p2506_p10 = scmp.lt.s32.totalorder %s2504_s25, %s2497_s27 }
  0x29   : > { %p2507_p13 = por %p2506_p10, %p2505_p7 }
  0x2b   : > { %p2508_p12 = pnand %p2507_p13, %p2501_p6 }
  0x2d   : > { %2511 = shalt.err (!%p2508_p12)
}
  0x2e   : > { %2400 = dma.hbm_to_vmem [thread:$0]  (!%p2806_p0), %s388_s12, 128, %s391_s17, %s2818_s14  }
  0x2f   : > { %p2832_p4 = pnand %p2217_p1, %p413_p2  ;;  %s370_s24 = scalar_lea.hbm %s3176_s0, %s2802_s16 }
  0x30   : > { %s364_s26 = scalar_lea.vmem [#allocation2], %s2799_s15  ;;  %s406_s10 = scalar_lea.hbm %s3178_s2, %s2802_s16 }
  0x31   : > { %s372_s27 = sshll.u32 %s364_s26, 4  ;;  %s3216_s30 = sand.u32 1, %s2640_s19   ;;  %s373_s27 = int_to_ptr.vmem [resolvable:$true] %s372_s27 }
  0x32   : > { %s361_s20 = scalar_lea.sflag [#allocation3], %s3216_s30  ;;  %s2525_s17 = scalar_lea.vmem %s373_s27, 128 }
  0x33   : > { %p2526_p12 = scmp.ne.s32.totalorder %s373_s27, %s2525_s17  ;;  %s2655_s12 = smov [#allocation2]  }
  0x34   : > { %s2530_s22 = sshll.u32 %s2655_s12, 4  ;;  %s2531_s22 = int_to_ptr.vmem [resolvable:$false] %s2530_s22 }
  0x35   : > { %p2528_p1 = pnand %p2526_p12, %p2486_p3  ;;  %s2532_s11 = scalar_lea.vmem %s2531_s22, 256 }
  0x36   : > { %p2533_p5 = scmp.lt.s32.totalorder %s373_s27, %s2531_s22  ;;  %p2534_p6 = scmp.lt.s32.totalorder %s2532_s11, %s2525_s17 }
  0x37   : > { %p2529_p2 = pneg %p2528_p1 }
  0x38   : > { %p2535_p7 = por %p2534_p6, %p2533_p5 }
  0x3a   : > { %p2536_p10 = pnand %p2535_p7, %p2529_p2 }
  0x3c   : > { %2539 = shalt.err (!%p2536_p10)
}
  0x3d   : > { %2397 = dma.hbm_to_vmem [thread:$0]  (!%p2806_p0), %s370_s24, 128, %s373_s27, %s361_s20  }
  0x3e   : > { %s401_s1 = scalar_lea.vmem [#allocation7], %s2799_s15  ;;  %s2656_s26 = smov [#allocation7]  }
  0x3f   : > { %s408_s30 = sshll.u32 %s401_s1, 4  ;;  %s2558_s22 = sshll.u32 %s2656_s26, 4  ;;  %s409_s30 = int_to_ptr.vmem [resolvable:$true] %s408_s30  ;;  %s2559_s22 = int_to_ptr.vmem [resolvable:$false] %s2558_s22 }
  0x40   : > { %s2553_s13 = scalar_lea.vmem %s409_s30, 128  ;;  %s2560_s25 = scalar_lea.vmem %s2559_s22, 256 }
  0x41   : > { %p2554_p13 = scmp.ne.s32.totalorder %s409_s30, %s2553_s13  ;;  %p2561_p2 = scmp.lt.s32.totalorder %s409_s30, %s2559_s22 }
  0x42   : > { %p2562_p5 = scmp.lt.s32.totalorder %s2560_s25, %s2553_s13 }
  0x43   : > { %p2556_p12 = pnand %p2554_p13, %p2486_p3 }
  0x44   : > { %p2563_p6 = por %p2562_p5, %p2561_p2 }
  0x45   : > { %p2557_p1 = pneg %p2556_p12 }
  0x47   : > { %p2564_p7 = pnand %p2563_p6, %p2557_p1 }
  0x49   : > { %2567 = shalt.err (!%p2564_p7)
}
  0x4a   : > { %2403 = dma.hbm_to_vmem [thread:$0]  (!%p2806_p0), %s406_s10, 128, %s409_s30, %s2818_s14  }
  0x4b   : > { %417 = sbr.rel (%p2832_p4) target bundleno = 1503 (0x5df), region = 64  ;;  %s2867_s24 = sand.u32 (!%p2832_p4), 1, %s2636_s18  }
  0x4c   : > { %s2870_s27 = sshll.u32 (!%p2832_p4), %s2867_s24, 3  ;;  %s420_s28 = scalar_lea.sflag (!%p2832_p4), [#allocation3], %s2867_s24 }
  0x4d   : > { %s423_s17 = scalar_lea.vmem (!%p2832_p4), [#allocation2], %s2870_s27 }
  0x50   : > { %2619 = dma.done.wait (%p2779_p8), %s420_s28, 128  }
  0x51   : > { %2621 = vsyncadd (%p2779_p8), %s420_s28, 4294967168  ;;  %s428_s10 = sand.u32 1, %s2759_s23   ;;  %s432_s16 = scalar_lea.vmem [#allocation5], %s2870_s27 }
  0x52   : > { %s429_s14 = scalar_lea.sflag [#allocation6], %s428_s10 }
  0x53   : > { %2623 = dma.done.wait (%p2779_p8), %s429_s14, 256  }
  0x54   : > { %2625 = vsyncadd (%p2779_p8), %s429_s14, 4294967040  ;;  %v2657_v0 = vmov 0.0   ;;  %vm2658_vm0 = vmmov 0   ;;  %v496_v1 = vld [vmem:[%s3179_s3 + $0x18] sm:$0xff]  ;;  %v495_v2 = vld [vmem:[%s3179_s3 + $0x10] sm:$0xff]  ;;  %vm504_vm1 = vcmask 261120   ;;  %v762_v28 = vlaneseq }
  0x55   : > { %2294 = vmatprep.subr.mxu1 %v2657_v0  ;;  %2302 = vmatprep.mubr.msk.f32.mxu1 %vm2658_vm0, %v2657_v0  ;;  %v494_v3 = vld [vmem:[%s3179_s3 + $0x8] sm:$0xff]  ;;  %v493_v4 = vld [vmem:[%s3179_s3] sm:$0xff]  ;;  %v581_v6 = vld [vmem:[%s3181_s5 + $0x18] sm:$0xff]  ;;  %s2660_s11 = smov 80   ;;  %s2661_s26 = smov 96   ;;  %vm1185_vm2 = vcmask 130048  }
  0x56   : > { %2316 = vmatprep.subr.mxu0 %v2657_v0  ;;  %2324 = vmatprep.mubr.msk.f32.mxu0 %vm2658_vm0, %v2657_v0  ;;  %v490_v5 = vld [vmem:[%s423_s17] sm:$0xff]  ;;  %v580_v7 = vld [vmem:[%s3181_s5 + $0x10] sm:$0xff]  ;;  %v665_v20 = vld [vmem:[%s3183_s7 + $0x18] sm:$0xff]  ;;  %s441_s28 = scalar_lea.vmem [#allocation7], %s2870_s27  ;;  %v2662_v26 = vmov 1983009808  }
  0x57   : > { %2295 = vmatpush3.msra.mxu1 %v496_v1  ;;  %v579_v8 = vld [vmem:[%s3181_s5 + $0x8] sm:$0xff]  ;;  %v578_v9 = vld [vmem:[%s3181_s5] sm:$0xff]  ;;  %v491_v10 = vld [vmem:[%s432_s16] sm:$0xff]  ;;  %s2659_s16 = smov 112   ;;  %2317 = vmatpush3.msra.mxu0 %v665_v20  ;;  %v760_v27 = vunpack.c.l.s4 %v2662_v26  ;;  %v2663_v29 = vmov 1934713408  }
  0x58   : > { %2296 = vmatprep.subr.mxu1 %v2657_v0  ;;  %v2222_v11 = vld [vmem:[%s3180_s4] ss:$0 sm:$0xff]  ;;  %2318 = vmatprep.subr.mxu0 %v2657_v0  ;;  %v664_v21 = vld [vmem:[%s3183_s7 + $0x10] sm:$0xff]  ;;  %v663_v22 = vld [vmem:[%s3183_s7 + $0x8] sm:$0xff]  ;;  %v792_v30 = vunpack.c.l.s4 %v2663_v29  ;;  %v763_v32 = vshrl.u32 %v762_v28, 7  ;;  %vm1490_vm3 = vcmask 64512  }
  0x59   : > { %2297 = vmatpush3.msra.mxu1 %v495_v2  ;;  %v2224_v16 = vld [vmem:[%s3182_s6] ss:$0 sm:$0xff]  ;;  %2319 = vmatpush3.msra.mxu0 %v664_v21  ;;  %v761_v31 = vunpack.c.0.s8 %v760_v27  ;;  %s2664_s17 = smov 32   ;;  %s3217_s10 = sld [smem:[#allocation13_spill]]  ;;  %vm1977_vm4 = vcmask 392192   ;;  %vm1994_vm5 = vcmask 523264  }
  0x5a   : > { %2298 = vmatprep.subr.mxu1 %v2657_v0  ;;  %2320 = vmatprep.subr.mxu0 %v2657_v0  ;;  %v662_v23 = vld [vmem:[%s3183_s7] sm:$0xff]  ;;  %v793_v35 = vunpack.c.0.s8 %v792_v30  ;;  %s2665_s14 = smov 16   ;;  %s2666_s23 = smov 48  }
  0x5b   : > { %2299 = vmatpush3.msra.mxu1 %v494_v3  ;;  %2321 = vmatpush3.msra.mxu0 %v663_v22  ;;  %v492_v24 = vld [vmem:[%s441_s28] sm:$0xff]  ;;  %v2967_v36 = vsub.s32 %v761_v31, %v763_v32  ;;  %s489_s1 = scalar_lea.vmem [#allocation8], %s2870_s27  ;;  %s3220_s22 = sld [smem:[#allocation22_spill]] }
  0x5c   : > { %2300 = vmatprep.subr.mxu1 %v2657_v0  ;;  %2322 = vmatprep.subr.mxu0 %v2657_v0  ;;  %v2969_v43 = vsub.s32 %v793_v35, %v763_v32  ;;  %s2084_s30 = sshll.u32 %s489_s1, 4  ;;  %s2070_s15 = scalar_lea.sflag [#allocation4], %s2867_s24  ;;  %s2085_s30 = int_to_ptr.vmem [resolvable:$true] %s2084_s30 }
  0x5d   : > { %2301 = vmatpush3.msra.mxu1 %v493_v4  ;;  %2323 = vmatpush3.msra.mxu0 %v662_v23  ;;  %s2568_s28 = scalar_lea.vmem %s2085_s30, 128 }
  0x5e   : > { %2303 = vmatmul.mubr.msk.f32.vlgmr.msra.gmra.mxu1 %vm504_vm1, %v490_v5  ;;  %2305 = vmatprep.subr.mxu1 %v2657_v0  ;;  %p2569_p8 = scmp.ne.s32.totalorder %s2085_s30, %s2568_s28 }
  0x5f   : > { %2306 = vmatpush3.msra.mxu1 %v581_v6  ;;  %2313 = vmatprep.mubr.msk.f32.mxu1 %vm2658_vm0, %v2657_v0  ;;  %s2251_s29 = sshll.u32 %s3217_s10, 7 }
  0x60   : > { %2307 = vmatprep.subr.mxu1 %v2657_v0  ;;  %2337 = vmatprep.subr.mxu0 %v2657_v0  ;;  %p2570_p0 = pnand %p2569_p8, %p2783_p9 }
  0x61   : > { %2308 = vmatpush3.msra.mxu1 %v580_v7  ;;  %2325 = vmatmul.mubr.msk.f32.vlgmr.msra.gmra.mxu0 %vm504_vm1, %v492_v24  ;;  %s3221_s25 = smov %s3220_s22  ;;  %s3133_s20 = scalar_lea.hbm %s3220_s22, %s2251_s29 }
  0x62   : > { %2309 = vmatprep.subr.mxu1 %v2657_v0  ;;  %2339 = vmatprep.mubr.msk.f32.mxu0 %vm2658_vm0, %v2657_v0  ;;  %p2571_p3 = pneg %p2570_p0 }
  0x63   : > { %2310 = vmatpush3.msra.mxu1 %v579_v8 }
  0x64   : > { %2311 = vmatprep.subr.mxu1 %v2657_v0 }
  0x65   : > { %2312 = vmatpush3.msra.mxu1 %v578_v9 }
  0x66   : > { %2314 = vmatmul.mubr.msk.f32.vlgmr.msra.gmra.mxu1 %vm504_vm1, %v491_v10  ;;  %2327 = vmatprep.subr.mxu1 %v2657_v0 }
  0x67   : > { %2329 = vmatprep.mubr.msk.f32.mxu1 %vm2658_vm0, %v2657_v0 }
 0x11e   : > { %v574_v12 = vpop.f32.mrf.mxu1 }
 0x11f   : > { %v575_v13 = vadd.f32 %v2222_v11, %v574_v12 }
 0x120   : > { %v2304_v14 = vpop.f32.mrf.mxu1 }
 0x121   : > { %v2933_v15 = vmul.f32 0.25, %v575_v13 }
 0x123   : > { %748 = vrot.lane.b32.xlu1 %v2933_v15, %s2659_s16 }
 0x126   : > { %v658_v17 = vpop.f32.mrf.mxu1 }
 0x127   : > { %v659_v18 = vadd.f32 %v2224_v16, %v658_v17 }
 0x128   : > { %v2315_v19 = vpop.f32.mrf.mxu1 }
 0x129   : > { %900 = vrot.lane.b32.xlu1 %v659_v18, %s2660_s11  ;;  %894 = vrot.lane.b32.xlu0 %v659_v18, %s2659_s16 }
 0x12d   : > { %754 = vrot.lane.b32.xlu1 %v2933_v15, %s2660_s11  ;;  %897 = vrot.lane.b32.xlu0 %v659_v18, %s2661_s26 }
 0x131   : > { %751 = vrot.lane.b32.xlu0 %v2933_v15, %s2661_s26 }
 0x195   : > { %v749_v25 = vpop.permute.xlu1 %748 }
 0x19b   : > { %v901_v33 = vpop.permute.xlu1 %900  ;;  %v895_v34 = vpop.permute.xlu0 %894 }
 0x19c   : > { %v919_v37 = vcombine.low %v895_v34, %v901_v33  ;;  %v920_v38 = vcombine.high %v895_v34, %v901_v33 }
 0x19e   : > { %v927_v44 = vrot.slane %v919_v37, %v2967_v36  ;;  %v934_v45 = vrot.slane %v920_v38, %v2967_v36 }
 0x19f   : > { %v898_v39 = vpop.permute.xlu0 %897  ;;  %v755_v40 = vpop.permute.xlu1 %754 }
 0x1a0   : > { %v903_v41 = vcombine.low %v659_v18, %v898_v39  ;;  %v904_v42 = vcombine.high %v659_v18, %v898_v39  ;;  %v773_v48 = vcombine.low %v749_v25, %v755_v40  ;;  %v774_v49 = vcombine.high %v749_v25, %v755_v40 }
 0x1a2   : > { %v911_v46 = vrot.slane %v903_v41, %v2967_v36  ;;  %v918_v47 = vrot.slane %v904_v42, %v2967_v36  ;;  %v781_v61 = vrot.slane %v773_v48, %v2967_v36  ;;  %v788_v62 = vrot.slane %v774_v49, %v2967_v36 }
 0x1a3   : > { %v752_v50 = vpop.permute.xlu0 %751 }
 0x1a4   : > { %v935_v51 = vcombine.low %v911_v46, %v927_v44  ;;  %v936_v52 = vcombine.high %v911_v46, %v927_v44  ;;  %v951_v53 = vcombine.low %v918_v47, %v934_v45  ;;  %v952_v54 = vcombine.high %v918_v47, %v934_v45 }
 0x1a5   : > { %v757_v55 = vcombine.low %v2933_v15, %v752_v50  ;;  %v758_v56 = vcombine.high %v2933_v15, %v752_v50 }
 0x1a6   : > { %v943_v57 = vrot.slane %v935_v51, %v2969_v43  ;;  %v950_v58 = vrot.slane %v936_v52, %v2969_v43  ;;  %v959_v59 = vrot.slane %v951_v53, %v2969_v43  ;;  %v966_v60 = vrot.slane %v952_v54, %v2969_v43  ;;  %v742_v52 = vpop.f32.mrf.mxu0 }
 0x1a7   : > { %v765_v63 = vrot.slane %v757_v55, %v2967_v36  ;;  %v772_v1 = vrot.slane %v758_v56, %v2967_v36 }
 0x1a8   : > { %v971_v2 = vcombine.low %v943_v57, %v950_v58  ;;  %v2230_v3 = vcombine.high %v943_v57, %v950_v58  ;;  %v987_v4 = vcombine.low %v959_v59, %v966_v60  ;;  %v2231_v5 = vcombine.high %v959_v59, %v966_v60  ;;  %v2326_v53 = vpop.f32.mrf.mxu0 }
 0x1a9   : > { %v789_v6 = vcombine.low %v765_v63, %v781_v61  ;;  %v790_v7 = vcombine.high %v765_v63, %v781_v61  ;;  %v805_v8 = vcombine.low %v772_v1, %v788_v62  ;;  %v806_v9 = vcombine.high %v772_v1, %v788_v62 }
 0x1aa   : > { %v978_v10 = vrot.slane %v971_v2, %v2967_v36  ;;  %v986_v11 = vrot.slane %v2230_v3, %v2967_v36  ;;  %v994_v12 = vrot.slane %v987_v4, %v2967_v36  ;;  %v1002_v13 = vrot.slane %v2231_v5, %v2967_v36  ;;  %v2226_v3 = vld [vmem:[%s3184_s8] ss:$0 sm:$0xff] }
 0x1ab   : > { %v797_v14 = vrot.slane %v789_v6, %v2969_v43  ;;  %v804_v15 = vrot.slane %v790_v7, %v2969_v43  ;;  %v813_v16 = vrot.slane %v805_v8, %v2969_v43  ;;  %v820_v17 = vrot.slane %v806_v9, %v2969_v43 }
 0x1ac   : > { %v1003_v18 = vcombine.low %v978_v10, %v986_v11  ;;  %v1004_v19 = vcombine.high %v978_v10, %v986_v11  ;;  %v1019_v20 = vcombine.low %v994_v12, %v1002_v13  ;;  %v1020_v21 = vcombine.high %v994_v12, %v1002_v13 }
 0x1ad   : > { %v825_v22 = vcombine.low %v797_v14, %v804_v15  ;;  %v2228_v23 = vcombine.high %v797_v14, %v804_v15  ;;  %v841_v24 = vcombine.low %v813_v16, %v820_v17  ;;  %v2229_v25 = vcombine.high %v813_v16, %v820_v17 }
 0x1ae   : > { %v1011_v26 = vrot.slane %v1003_v18, %v2969_v43  ;;  %v1027_v27 = vrot.slane %v1019_v20, %v2969_v43  ;;  %v1018_v28 = vrot.slane %v1004_v19, %v2969_v43  ;;  %v1034_v29 = vrot.slane %v1020_v21, %v2969_v43 }
 0x1af   : > { %v832_v30 = vrot.slane %v825_v22, %v2967_v36  ;;  %v840_v31 = vrot.slane %v2228_v23, %v2967_v36  ;;  %v848_v32 = vrot.slane %v841_v24, %v2967_v36  ;;  %v856_v33 = vrot.slane %v2229_v25, %v2967_v36 }
 0x1b0   : > { %v1035_v34 = vcombine.low %v1011_v26, %v1027_v27  ;;  %v1037_v35 = vcombine.low %v1018_v28, %v1034_v29  ;;  %v1036_v48 = vcombine.high %v1011_v26, %v1027_v27  ;;  %v1038_v50 = vcombine.high %v1018_v28, %v1034_v29 }
 0x1b1   : > { %v857_v37 = vcombine.low %v832_v30, %v840_v31  ;;  %v858_v38 = vcombine.high %v832_v30, %v840_v31  ;;  %v873_v39 = vcombine.low %v848_v32, %v856_v33  ;;  %v874_v40 = vcombine.high %v848_v32, %v856_v33 }
 0x1b2   : > { %2328 = vmatpush3.xpose.msk.msra.mxu1 %vm1185_vm2, %v1035_v34  ;;  %2338 = vmatpush3.xpose.msk.msra.mxu0 %vm1185_vm2, %v1037_v35  ;;  %v743_v4 = vadd.f32 %v2226_v3, %v742_v52 }
 0x1b3   : > { %2332 = vmatprep.subr.mxu1 %v2657_v0  ;;  %v865_v41 = vrot.slane %v857_v37, %v2969_v43  ;;  %v881_v42 = vrot.slane %v873_v39, %v2969_v43  ;;  %v872_v44 = vrot.slane %v858_v38, %v2969_v43  ;;  %v888_v45 = vrot.slane %v874_v40, %v2969_v43 }
 0x1b4   : > { %2347 = vmatprep.subr.mxu0 %v2657_v0 }
 0x1b5   : > { %v889_v46 = vcombine.low %v865_v41, %v881_v42  ;;  %v891_v47 = vcombine.low %v872_v44, %v888_v45  ;;  %v890_v49 = vcombine.high %v865_v41, %v881_v42  ;;  %v892_v51 = vcombine.high %v872_v44, %v888_v45 }
 0x1b7   : > { %2330 = vmatmul.mubr.msk.f32.vlgmr.msra.gmra.mxu1 %vm1185_vm2, %v889_v46  ;;  %2340 = vmatmul.mubr.msk.f32.vlgmr.msra.gmra.mxu0 %vm1185_vm2, %v891_v47 }
 0x1b8   : > { %2333 = vmatpush3.xpose.msk.msra.mxu1 %vm1185_vm2, %v1036_v48  ;;  %2334 = vmatprep.mubr.msk.f32.mxu1 %vm2658_vm0, %v2657_v0 }
 0x1b9   : > { %2342 = vmatprep.subr.mxu1 %v2657_v0  ;;  %2349 = vmatprep.mubr.msk.f32.mxu0 %vm2658_vm0, %v2657_v0 }
 0x1bb   : > { %2335 = vmatmul.mubr.msk.f32.vlgmr.msra.gmra.mxu1 %vm1185_vm2, %v890_v49 }
 0x1bc   : > { %2343 = vmatpush3.xpose.msk.msra.mxu1 %vm1185_vm2, %v1038_v50  ;;  %2344 = vmatprep.mubr.msk.f32.mxu1 %vm2658_vm0, %v2657_v0 }
 0x1bd   : > { %2352 = vmatprep.subr.mxu1 %v2657_v0 }
 0x1bf   : > { %2345 = vmatmul.mubr.msk.f32.vlgmr.msra.gmra.mxu1 %vm1185_vm2, %v892_v51 }
 0x1c0   : > { %2354 = vmatprep.mubr.msk.f32.mxu1 %vm2658_vm0, %v2657_v0 }
 0x277   : > { %v1258_v54 = vpop.f32.mrf.mxu1  ;;  %v1410_v55 = vpop.f32.mrf.mxu0 }
 0x278   : > { %v1491_v56 = vsel %vm1490_vm3, %v1258_v54, -inf  ;;  %v1497_v60 = vsel %vm1490_vm3, %v1410_v55, -inf }
 0x279   : > { %v2341_v57 = vpop.f32.mrf.mxu0  ;;  %1492 = vmax.xlane.f32.xlu0 %v1491_v56  ;;  %v2331_v58 = vpop.f32.mrf.mxu1 }
 0x27b   : > { %v1334_v59 = vpop.f32.mrf.mxu1 }
 0x27c   : > { %v1494_v61 = vsel %vm1490_vm3, %v1334_v59, -inf }
 0x27d   : > { %1498 = vmax.xlane.f32.xlu0 %v1497_v60  ;;  %1495 = vmax.xlane.f32.xlu1 %v1494_v61  ;;  %v2336_v62 = vpop.f32.mrf.mxu1 }
 0x27f   : > { %v1486_v63 = vpop.f32.mrf.mxu1 }
 0x280   : > { %v1500_v1 = vsel %vm1490_vm3, %v1486_v63, -inf }
 0x281   : > { %1501 = vmax.xlane.f32.xlu0 %v1500_v1  ;;  %v2346_v2 = vpop.f32.mrf.mxu1 }
 0x28e   : > { %1040 = vrot.lane.b32.xlu1 %v743_v4, %s2659_s16 }
 0x302   : > { %v1493_v5 = vpop.xlane.xlu0 %1492 }
 0x303   : > { %v1503_v6 = vsub.f32 %v1258_v54, %v1493_v5 }
 0x305   : > { %v1507_v7 = vmul.f32 1.442695, %v1503_v6 }
 0x306   : > { %v1499_v8 = vpop.xlane.xlu0 %1498  ;;  %v1496_v9 = vpop.xlane.xlu1 %1495 }
 0x307   : > { %2468 = vpow2.f32 %v1507_v7  ;;  %v1505_v10 = vsub.f32 %v1410_v55, %v1499_v8  ;;  %v1504_v11 = vsub.f32 %v1334_v59, %v1496_v9 }
 0x309   : > { %v1511_v12 = vmul.f32 1.442695, %v1505_v10  ;;  %v1509_v13 = vmul.f32 1.442695, %v1504_v11 }
 0x30a   : > { %v1502_v14 = vpop.xlane.xlu0 %1501  ;;  %v1041_v25 = vpop.permute.xlu1 %1040 }
 0x30b   : > { %2470 = vpow2.f32 %v1511_v12  ;;  %v1506_v15 = vsub.f32 %v1486_v63, %v1502_v14 }
 0x30c   : > { %2472 = vpow2.f32 %v1509_v13 }
 0x30d   : > { %v1513_v16 = vmul.f32 1.442695, %v1506_v15  ;;  %v1986_v15 = vld [vmem:[%s3185_s9 + $0x38] sm:$0xff] }
 0x30f   : > { %2474 = vpow2.f32 %v1513_v16  ;;  %v1985_v16 = vld [vmem:[%s3185_s9 + $0x30] sm:$0xff] }
 0x314   : > { %v2469_v17 = vpop.eup %2468 }
 0x315   : > { %v1515_v18 = vsel %vm1490_vm3, %v2469_v17, 0.0 }
 0x316   : > { %1516 = vadd.xlane.f32.xlu1 %v1515_v18  ;;  %v1983_v18 = vld [vmem:[%s3185_s9 + $0x20] sm:$0xff] }
 0x318   : > { %v3034_v19 = vpop.eup %2470 }
 0x319   : > { %v2473_v20 = vpop.eup %2472  ;;  %v1521_v21 = vsel %vm1490_vm3, %v3034_v19, 0.0 }
 0x31a   : > { %1522 = vadd.xlane.f32.xlu1 %v1521_v21  ;;  %v1518_v22 = vsel %vm1490_vm3, %v2473_v20, 0.0 }
 0x31b   : > { %1519 = vadd.xlane.f32.xlu0 %v1518_v22 }
 0x31c   : > { %v3039_v23 = vpop.eup %2474 }
 0x31d   : > { %v1524_v24 = vsel %vm1490_vm3, %v3039_v23, 0.0 }
 0x31f   : > { %1525 = vadd.xlane.f32.xlu0 %v1524_v24 }
 0x32b   : > { %1046 = vrot.lane.b32.xlu1 %v743_v4, %s2660_s11  ;;  %s3219_s11 = sld [smem:[#allocation21_spill]] }
 0x335   : > { %1043 = vrot.lane.b32.xlu0 %v743_v4, %s2661_s26 }
 0x39f   : > { %v1517_v26 = vpop.xlane.xlu1 %1516 }
 0x3a0   : > { %2476 = vrcp.f32 %v1517_v26 }
 0x3a3   : > { %v1523_v27 = vpop.xlane.xlu1 %1522 }
 0x3a4   : > { %v1520_v28 = vpop.xlane.xlu0 %1519 }
 0x3a5   : > { %2478 = vrcp.f32 %v1520_v28 }
 0x3a6   : > { %2480 = vrcp.f32 %v1523_v27 }
 0x3a7   : > { %v1047_v29 = vpop.permute.xlu1 %1046 }
 0x3a8   : > { %v1526_v30 = vpop.xlane.xlu0 %1525  ;;  %v1065_v31 = vcombine.low %v1041_v25, %v1047_v29  ;;  %v1066_v32 = vcombine.high %v1041_v25, %v1047_v29 }
 0x3a9   : > { %2482 = vrcp.f32 %v1526_v30 }
 0x3aa   : > { %v1073_v37 = vrot.slane %v1065_v31, %v2967_v36  ;;  %v1080_v38 = vrot.slane %v1066_v32, %v2967_v36 }
 0x3ac   : > { %v1044_v33 = vpop.permute.xlu0 %1043 }
 0x3ad   : > { %v1049_v34 = vcombine.low %v743_v4, %v1044_v33  ;;  %v1050_v35 = vcombine.high %v743_v4, %v1044_v33  ;;  %v2477_v62 = vpop.eup %2476 }
 0x3ae   : > { %v1531_v8 = vmul.f32 %v2477_v62, %v2469_v17  ;;  %v1984_v17 = vld [vmem:[%s3185_s9 + $0x28] sm:$0xff] }
 0x3af   : > { %v1057_v39 = vrot.slane %v1049_v34, %v2967_v36  ;;  %v1064_v40 = vrot.slane %v1050_v35, %v2967_v36 }
 0x3b1   : > { %v1081_v41 = vcombine.low %v1057_v39, %v1073_v37  ;;  %v1082_v42 = vcombine.high %v1057_v39, %v1073_v37  ;;  %v1097_v44 = vcombine.low %v1064_v40, %v1080_v38  ;;  %v1098_v45 = vcombine.high %v1064_v40, %v1080_v38 }
 0x3b2   : > { %v2479_v63 = vpop.eup %2478 }
 0x3b3   : > { %v1089_v46 = vrot.slane %v1081_v41, %v2969_v43  ;;  %v1096_v47 = vrot.slane %v1082_v42, %v2969_v43  ;;  %v1105_v48 = vrot.slane %v1097_v44, %v2969_v43  ;;  %v1112_v49 = vrot.slane %v1098_v45, %v2969_v43  ;;  %v2481_v5 = vpop.eup %2480  ;;  %v1981_v41 = vld [vmem:[%s3185_s9 + $0x10] sm:$0xff]  ;;  %v1980_v42 = vld [vmem:[%s3185_s9 + $0x8] sm:$0xff] }
 0x3b4   : > { %v1532_v9 = vmul.f32 %v2479_v63, %v2473_v20  ;;  %v1533_v13 = vmul.f32 %v2481_v5, %v3034_v19  ;;  %v1982_v19 = vld [vmem:[%s3185_s9 + $0x18] sm:$0xff] }
 0x3b5   : > { %v1117_v50 = vcombine.low %v1089_v46, %v1096_v47  ;;  %v2232_v51 = vcombine.high %v1089_v46, %v1096_v47  ;;  %v1133_v52 = vcombine.low %v1105_v48, %v1112_v49  ;;  %v2233_v53 = vcombine.high %v1105_v48, %v1112_v49 }
 0x3b6   : > { %v2483_v10 = vpop.eup %2482 }
 0x3b7   : > { %v1124_v54 = vrot.slane %v1117_v50, %v2967_v36  ;;  %v1132_v55 = vrot.slane %v2232_v51, %v2967_v36  ;;  %v1140_v56 = vrot.slane %v1133_v52, %v2967_v36  ;;  %v1148_v57 = vrot.slane %v2233_v53, %v2967_v36  ;;  %v1979_v52 = vld [vmem:[%s3185_s9] sm:$0xff] }
 0x3b8   : > { %v1534_v14 = vmul.f32 %v2483_v10, %v3039_v23 }
 0x3b9   : > { %v1149_v58 = vcombine.low %v1124_v54, %v1132_v55  ;;  %v1165_v59 = vcombine.low %v1140_v56, %v1148_v57  ;;  %v1150_v60 = vcombine.high %v1124_v54, %v1132_v55  ;;  %v1166_v61 = vcombine.high %v1140_v56, %v1148_v57 }
 0x3bb   : > { %v1157_v1 = vrot.slane %v1149_v58, %v2969_v43  ;;  %v1173_v2 = vrot.slane %v1165_v59, %v2969_v43  ;;  %v1164_v3 = vrot.slane %v1150_v60, %v2969_v43  ;;  %v1180_v4 = vrot.slane %v1166_v61, %v2969_v43 }
 0x3bd   : > { %v1181_v6 = vcombine.low %v1157_v1, %v1173_v2  ;;  %v1182_v7 = vcombine.high %v1157_v1, %v1173_v2  ;;  %v1183_v11 = vcombine.low %v1164_v3, %v1180_v4  ;;  %v1184_v12 = vcombine.high %v1164_v3, %v1180_v4 }
 0x3bf   : > { %2348 = vmatpush3.msra.mxu0 %v1181_v6  ;;  %2353 = vmatpush3.msra.mxu1 %v1182_v7 }
 0x3c0   : > { %2350 = vmatmul.mubr.msk.f32.vlgmr.msra.gmra.mxu0 %vm1490_vm3, %v1531_v8  ;;  %2355 = vmatmul.mubr.msk.f32.vlgmr.msra.gmra.mxu1 %vm1490_vm3, %v1532_v9  ;;  %v2248_v9 = vld [vmem:[%s3219_s11] ss:$0 sm:$0xff] }
 0x3c1   : > { %2357 = vmatprep.subr.mxu0 %v2657_v0  ;;  %2362 = vmatprep.subr.mxu1 %v2657_v0 }
 0x3c2   : > { %2358 = vmatpush3.msra.mxu0 %v1183_v11  ;;  %2363 = vmatpush3.msra.mxu1 %v1184_v12 }
 0x3c3   : > { %2359 = vmatprep.mubr.msk.f32.mxu0 %vm2658_vm0, %v2657_v0  ;;  %2364 = vmatprep.mubr.msk.f32.mxu1 %vm2658_vm0, %v2657_v0 }
 0x3c4   : > { %2360 = vmatmul.mubr.msk.f32.vlgmr.msra.gmra.mxu0 %vm1490_vm3, %v1533_v13  ;;  %2365 = vmatmul.mubr.msk.f32.vlgmr.msra.gmra.mxu1 %vm1490_vm3, %v1534_v14 }
 0x3c5   : > { %2367 = vmatprep.subr.mxu0 %v2657_v0  ;;  %2383 = vmatprep.mubr.msk.f32.mxu0 %vm2658_vm0, %v2657_v0 }
 0x3c6   : > { %2368 = vmatpush3.msra.mxu0 %v1986_v15 }
 0x3c7   : > { %2369 = vmatprep.subr.mxu0 %v2657_v0 }
 0x3c8   : > { %2370 = vmatpush3.msra.mxu0 %v1985_v16 }
 0x3c9   : > { %2371 = vmatprep.subr.mxu0 %v2657_v0 }
 0x3ca   : > { %2372 = vmatpush3.msra.mxu0 %v1984_v17 }
 0x3cb   : > { %2373 = vmatprep.subr.mxu0 %v2657_v0 }
 0x3cc   : > { %2374 = vmatpush3.msra.mxu0 %v1983_v18 }
 0x3cd   : > { %2375 = vmatprep.subr.mxu0 %v2657_v0 }
 0x3ce   : > { %2376 = vmatpush3.msra.mxu0 %v1982_v19 }
 0x3cf   : > { %2377 = vmatprep.subr.mxu0 %v2657_v0 }
 0x3d0   : > { %2378 = vmatpush3.msra.mxu0 %v1981_v41 }
 0x3d1   : > { %2379 = vmatprep.subr.mxu0 %v2657_v0 }
 0x3d2   : > { %2380 = vmatpush3.msra.mxu0 %v1980_v42 }
 0x3d3   : > { %2381 = vmatprep.subr.mxu0 %v2657_v0 }
 0x3d4   : > { %2382 = vmatpush3.msra.mxu0 %v1979_v52 }
 0x480   : > { %v1604_v20 = vpop.f32.mrf.mxu0  ;;  %v1677_v21 = vpop.f32.mrf.mxu1 }
 0x482   : > { %v2351_v22 = vpop.f32.mrf.mxu0  ;;  %v2356_v23 = vpop.f32.mrf.mxu1 }
 0x484   : > { %v1750_v24 = vpop.f32.mrf.mxu0  ;;  %v1823_v25 = vpop.f32.mrf.mxu1 }
 0x485   : > { %v1827_v26 = vcombine.low %v1604_v20, %v1750_v24  ;;  %v1828_v27 = vcombine.high %v1604_v20, %v1750_v24  ;;  %v1843_v28 = vcombine.low %v1677_v21, %v1823_v25  ;;  %v1844_v29 = vcombine.high %v1677_v21, %v1823_v25 }
 0x486   : > { %v2361_v30 = vpop.f32.mrf.mxu0  ;;  %v2366_v31 = vpop.f32.mrf.mxu1 }
 0x487   : > { %v1835_v32 = vrot.slane %v1827_v26, %v2967_v36  ;;  %v1842_v33 = vrot.slane %v1828_v27, %v2967_v36  ;;  %v1851_v34 = vrot.slane %v1843_v28, %v2967_v36  ;;  %v1858_v35 = vrot.slane %v1844_v29, %v2967_v36 }
 0x489   : > { %v1859_v37 = vcombine.low %v1835_v32, %v1851_v34  ;;  %v1860_v38 = vcombine.high %v1835_v32, %v1851_v34  ;;  %v1875_v39 = vcombine.low %v1842_v33, %v1858_v35  ;;  %v1876_v40 = vcombine.high %v1842_v33, %v1858_v35 }
 0x48b   : > { %v1867_v44 = vrot.slane %v1859_v37, %v2969_v43  ;;  %v1874_v45 = vrot.slane %v1860_v38, %v2969_v43  ;;  %v1883_v46 = vrot.slane %v1875_v39, %v2969_v43  ;;  %v1890_v47 = vrot.slane %v1876_v40, %v2969_v43 }
 0x48d   : > { %v1895_v48 = vcombine.low %v1867_v44, %v1874_v45  ;;  %v2246_v49 = vcombine.high %v1867_v44, %v1874_v45  ;;  %v1911_v50 = vcombine.low %v1883_v46, %v1890_v47  ;;  %v2247_v51 = vcombine.high %v1883_v46, %v1890_v47 }
 0x48f   : > { %v1902_v53 = vrot.slane %v1895_v48, %v2967_v36  ;;  %v1910_v54 = vrot.slane %v2246_v49, %v2967_v36  ;;  %v1918_v55 = vrot.slane %v1911_v50, %v2967_v36  ;;  %v1926_v56 = vrot.slane %v2247_v51, %v2967_v36 }
 0x491   : > { %v1928_v57 = vcombine.high %v1902_v53, %v1910_v54  ;;  %v1944_v58 = vcombine.high %v1918_v55, %v1926_v56  ;;  %v1927_v59 = vcombine.low %v1902_v53, %v1910_v54  ;;  %v1943_v60 = vcombine.low %v1918_v55, %v1926_v56 }
 0x493   : > { %v1942_v61 = vrot.slane %v1928_v57, %v2969_v43  ;;  %v1958_v0 = vrot.slane %v1944_v58, %v2969_v43  ;;  %v1935_v62 = vrot.slane %v1927_v59, %v2969_v43  ;;  %v1951_v63 = vrot.slane %v1943_v60, %v2969_v43 }
 0x495   : > { %v1961_v1 = vcombine.low %v1942_v61, %v1958_v0  ;;  %v1960_v2 = vcombine.high %v1935_v62, %v1951_v63  ;;  %v1959_v3 = vcombine.low %v1935_v62, %v1951_v63  ;;  %v1962_v36 = vcombine.high %v1942_v61, %v1958_v0 }
 0x497   : > { %1968 = vrot.lane.b32.xlu0 %v1961_v1, %s2664_s17  ;;  %1964 = vrot.lane.b32.xlu1 %v1960_v2, %s2665_s14  ;;  %s2667_s17 = smov [#allocation8]  }
 0x498   : > { %s2572_s27 = sshll.u32 %s2667_s17, 4  ;;  %s2573_s27 = int_to_ptr.vmem [resolvable:$false] %s2572_s27 }
 0x499   : > { %s2574_s10 = scalar_lea.vmem %s2573_s27, 256  ;;  %p2575_p4 = scmp.lt.s32.totalorder %s2085_s30, %s2573_s27 }
 0x49a   : > { %p2576_p10 = scmp.lt.s32.totalorder %s2574_s10, %s2568_s28 }
 0x49b   : > { %1972 = vrot.lane.b32.xlu1 %v1962_v36, %s2666_s23 }
 0x49c   : > { %p2577_p13 = por %p2576_p10, %p2575_p4 }
 0x49e   : > { %p2578_p12 = pnand %p2577_p13, %p2571_p3 }
 0x509   : > { %v1965_v4 = vpop.permute.xlu1 %1964  ;;  %v1969_v5 = vpop.permute.xlu0 %1968 }
 0x50a   : > { %v1975_v6 = vsel %vm1185_vm2, %v1959_v3, %v1965_v4 }
 0x50b   : > { %v1976_v7 = vsel %vm504_vm1, %v1975_v6, %v1969_v5 }
 0x50d   : > { %v1973_v43 = vpop.permute.xlu1 %1972 }
 0x50e   : > { %v1978_v8 = vsel %vm1977_vm4, %v1976_v7, %v1973_v43 }
 0x50f   : > { %2384 = vmatmul.mubr.msk.f32.vlgmr.msra.gmra.mxu0 %vm1994_vm5, %v1978_v8 }
 0x5cf   : > { %v2064_v10 = vpop.f32.mrf.mxu0 }
 0x5d0   : > { %v2065_v11 = vadd.f32 %v2248_v9, %v2064_v10 }
 0x5d1   : > { %v2385_v12 = vpop.f32.mrf.mxu0 }
 0x5d2   : > { %2068 = vst.msk [vmem:[%s489_s1] sm:$0xff] %vm504_vm1, %v2065_v11 }
 0x5d3   : > { %2581 = shalt.err (!%p2578_p12)
}
 0x5d4   : > { %s2582_s14 = scalar_lea.hbm %s3133_s20, 128  ;;  %s2586_s21 = scalar_lea.hbm %s3221_s25, 256 }
 0x5d5   : > { %p2583_p1 = scmp.ne.s32.totalorder %s3133_s20, %s2582_s14  ;;  %p2587_p6 = scmp.lt.s32.totalorder %s3133_s20, %s3221_s25 }
 0x5d6   : > { %p2588_p7 = scmp.lt.s32.totalorder %s2586_s21, %s2582_s14 }
 0x5d7   : > { %p2584_p2 = pnand %p2583_p1, %p2783_p9 }
 0x5d8   : > { %p2589_p8 = por %p2588_p7, %p2587_p6 }
 0x5d9   : > { %p2585_p5 = pneg %p2584_p2 }
 0x5db   : > { %p2590_p0 = pnand %p2589_p8, %p2585_p5 }
 0x5dd   : > { %2593 = shalt.err (!%p2590_p0)
}
 0x5de   : > { %2392 = dma.vmem_to_hbm [thread:$0]  (%p2783_p9), %s2085_s30, 128, %s3133_s20, %s2070_s15  }
 0x5df PF: > { %s3222_s29 = sld [smem:[#allocation12_spill]] }
 0x5e0   : > { %s3224_s13 = sld [smem:[#allocation15_spill]] }
 0x5e5   : > { %s2096_s26 = sand.u32 1, %s3222_s29  }
 0x5e6   : > { %p3225_p3 = scmp.ge.s32.totalorder %s3224_s13, 2  ;;  %s2097_s22 = scalar_lea.sflag [#allocation4], %s2096_s26 }
 0x5e8   : > { %p2405_p4 = pnand %p3225_p3, %p2790_p11 }
 0x5ea   : > { %p2406_p10 = pneg %p2405_p4 }
 0x5ec   : > { %2627 = dma.done.wait (%p2406_p10), %s2097_s22, 128  }
 0x5ed   : > { %2629 = vsyncadd (%p2406_p10), %s2097_s22, 4294967168  ;;  %s30_s22 = sadd.s32 1, %s3224_s13   ;;  %s3226_s16 = sld [smem:[#allocation18_spill]] }
 0x5ee   : > { %p27_p13 = scmp.ge.s32.totalorder %s30_s22, 4   ;;  %s3227_s20 = sld [smem:[#allocation14_spill]] }
 0x5ef   : > { %s3228_s21 = sld [smem:[#allocation16_spill]]  ;;  %s3229_s17 = smov %s2636_s18 }
 0x5f0   : > { %s3230_s18 = smov %s2640_s19  ;;  %29 = sbr.rel (!%p27_p13) target bundleno = 12 (0xc), region = 133 }
 0x5f3   : > { %s3231_s19 = smov %s3226_s16 }
 0x5f5   :  { %2102 = vsyncpa [#allocation3], 1 }
 0x5f6   :  { %2104 = vsyncpa [#allocation3 + $0x1], 1 }
 0x5f7   :  { %2105 = vsyncpa [#allocation6], 1 }
 0x5f8   :  { %2107 = vsyncpa [#allocation6 + $0x1], 1 }
 0x5f9   :  { %2108 = vsyncpa [#allocation4], 1 }
 0x5fa   :  { %2110 = vsyncpa [#allocation4 + $0x1], 1 }

</bundles_post_ra>
